<compile_context>
chip_gen: v6e
topology: v6e:2x2x1
jax: 0.10.0
libtpu: 0.0.40
codegen_flags: <defaults>
</compile_context>

<pallas_src>
import functools

import jax
import jax.numpy as jnp
from jax import lax
from jax.experimental import pallas as pl
from jax.experimental.pallas import tpu as pltpu

EPS = 1e-5


# ------------------------------ Pallas kernel --------------------------------
def resnet_block_kernel(x_ref, b1_ref, b2_ref, s_ref, red_ref, bro_ref,
                        vec_ref, o_ref, *, H, inv_m):
    """Fused ResNet block in (N*H, W*C) lane-dense layout.

    x_ref   : (NH, W*Cin)       input rows (row r = image r//H, image-row r%H)
    b1_ref  : (3*W*Cin, W*Ch)   conv1 fused band matrix (dy-major)
    b2_ref  : (3*W*Ch, W*Cout)  conv2 fused band matrix
    s_ref   : (W*Cin, W*Cout)   block-diagonal 1x1 skip-conv matrix
    red_ref : (W*Cout, Cout)    0/1 lane -> channel reduce matrix
    bro_ref : (Cout, W*Cout)    0/1 channel -> lane broadcast matrix
    vec_ref : (8, W*Cout)       rows: g1, be1, g2, be2, skip-bias, 0, 0, 0
    o_ref   : (NH, W*Cout)
    H, inv_m: static (image height, 1 / (N*H*W))
    """
    f32 = jnp.float32
    x = x_ref[...]
    NH, K = x.shape

    # Image-row border masks (shared by both convs: W*Cin_pad == W*Ch == K).
    row = lax.broadcasted_iota(jnp.int32, (NH, K), 0) % H
    not_top = row != 0
    not_bot = row != (H - 1)

    def conv3x3(a, band_ref):
        # dy shifts on the XLU (sublane roll) + border zeroing; the dx taps and
        # the W-direction zero padding live inside the fused band matrix.
        # Conv biases are omitted: exactly cancelled by BN mean subtraction.
        a_up = jnp.where(not_top, pltpu.roll(a, shift=1, axis=0), 0.0)
        a_dn = jnp.where(not_bot, pltpu.roll(a, shift=NH - 1, axis=0), 0.0)
        a_cat = jnp.concatenate([a_up, a, a_dn], axis=1)          # (NH, 3K)
        return jnp.dot(a_cat, band_ref[...], preferred_element_type=f32)

    red = red_ref[...]
    bro = bro_ref[...]
    vec = vec_ref[...]

    def batchnorm(acc, g, be):
        # Training-mode batch stats (biased variance), single pass:
        # per-lane [sum; sum-of-squares] -> per-channel (reduce matmul)
        # -> back to the lane layout (broadcast matmul).
        stats = jnp.concatenate(
            [jnp.sum(acc, axis=0, keepdims=True),
             jnp.sum(acc * acc, axis=0, keepdims=True)], axis=0)  # (2, K)
        per_c = jnp.dot(stats, red, preferred_element_type=f32)   # (2, C)
        back = jnp.dot(per_c, bro, preferred_element_type=f32) * inv_m
        mean = back[0:1, :]
        var = back[1:2, :] - mean * mean
        scale = g * lax.rsqrt(var + EPS)
        shift = be - mean * scale
        return acc * scale + shift

    # conv1 -> bn1 -> relu
    h = jnp.maximum(batchnorm(conv3x3(x, b1_ref), vec[0:1, :], vec[1:2, :]), 0.0)
    # conv2 -> bn2
    out = batchnorm(conv3x3(h, b2_ref), vec[2:3, :], vec[3:4, :])
    # skip: 1x1 conv on the resident x (block-diagonal matmul) + bias
    skip = jnp.dot(x, s_ref[...], preferred_element_type=f32) + vec[4:5, :]

    o_ref[...] = jnp.maximum(out + skip, 0.0)


# ------------------------- wrapper-side weight prep ---------------------------
def band_matrices(w, W):
    """w: (3,3,Cin,Cout) HWIO -> fused (3*W*Cin, W*Cout) band matrix (dy-major).

    B[dy, xi*Cin+ci, xo*Cout+co] = w[dy, xi-xo+1, ci, co] if |xi-xo| <= 1 else 0.
    Out-of-range dx taps (the 1-pixel W padding) are simply absent -> zero pad.
    """
    Cin, Cout = w.shape[2], w.shape[3]
    xi = jnp.arange(W)
    xo = jnp.arange(W)
    dx = jnp.arange(3)
    sel = (xi[None, :, None] == (xo[None, None, :] + dx[:, None, None] - 1)
           ).astype(jnp.float32)
    b = jnp.einsum("dxy,zdio->zxiyo", sel, w.astype(jnp.float32))
    return b.reshape(3 * W * Cin, W * Cout)


def skip_matrix(ws, W):
    """ws: (Cin, Cout) 1x1-conv weights -> block-diagonal (W*Cin, W*Cout)."""
    Cin, Cout = ws.shape
    s = jnp.einsum("io,xy->xiyo", ws.astype(jnp.float32),
                   jnp.eye(W, dtype=jnp.float32))
    return s.reshape(W * Cin, W * Cout)


def make_resnet_block(p, N, H, W, Cin):
    """One-time weight/layout prep + a jitted per-call wrapper (prep hoisted)."""
    Ch = p["w1"].shape[-1]
    Cout = p["w2"].shape[-1]
    assert Ch == Cout, "fused BN reduce/broadcast matrices assume hidden_c == out_c"
    NH = N * H

    # Pad input channels so W*Cin is a full 128-lane multiple.
    Cin_pad = Cin
    if (W * Cin) % 128 != 0 and 128 % W == 0:
        Cin_pad = max(Cin, ((W * Cin + 127) // 128) * (128 // W))

    w1p = jnp.pad(p["w1"].astype(jnp.float32),
                  ((0, 0), (0, 0), (0, Cin_pad - Cin), (0, 0)))
    wsp = jnp.pad(p["ws"].astype(jnp.float32), ((0, Cin_pad - Cin), (0, 0)))

    b1 = band_matrices(w1p, W)                                   # (3*W*Cin_pad, W*Ch)
    b2 = band_matrices(p["w2"], W)                               # (3*W*Ch, W*Cout)
    s = skip_matrix(wsp, W)                                      # (W*Cin_pad, W*Cout)
    red = jnp.tile(jnp.eye(Cout, dtype=jnp.float32), (W, 1))     # (W*Cout, Cout)
    bro = jnp.tile(jnp.eye(Cout, dtype=jnp.float32), (1, W))     # (Cout, W*Cout)
    vecs = jnp.concatenate(
        [jnp.tile(p["g1"].astype(jnp.float32), (1, W)),
         jnp.tile(p["be1"].astype(jnp.float32), (1, W)),
         jnp.tile(p["g2"].astype(jnp.float32), (1, W)),
         jnp.tile(p["be2"].astype(jnp.float32), (1, W)),
         jnp.tile(p["bs"].astype(jnp.float32), (1, W)),
         jnp.zeros((3, W * Cout), jnp.float32)], axis=0)         # (8, W*Cout)

    kern = functools.partial(resnet_block_kernel, H=H, inv_m=1.0 / (N * H * W))
    vmem = pl.BlockSpec(memory_space=pltpu.MemorySpace.VMEM)
    call = pl.pallas_call(
        kern,
        out_shape=jax.ShapeDtypeStruct((NH, W * Cout), jnp.float32),
        in_specs=[vmem] * 7,
        out_specs=vmem,
    )

    @jax.jit
    def run(x_nhwc):
        xp = jnp.pad(x_nhwc.astype(jnp.float32),
                     ((0, 0), (0, 0), (0, 0), (0, Cin_pad - Cin)))
        x_flat = xp.reshape(NH, W * Cin_pad)     # contiguous, lane-dense
        out_flat = call(x_flat, b1, b2, s, red, bro, vecs)
        return out_flat.reshape(N, H, W, Cout)

    return run


# ---------------------------- pure-JAX reference -----------------------------
def ref_block(x_nhwc, p):
    def conv(x, w, b, pad):
        y = lax.conv_general_dilated(
            x, w, (1, 1), [(pad, pad), (pad, pad)],
            dimension_numbers=("NHWC", "HWIO", "NHWC"))
        return y + b.reshape(1, 1, 1, -1)

    def bn(y, g, be):
        mu = jnp.mean(y, axis=(0, 1, 2), keepdims=True)
        var = jnp.mean((y - mu) ** 2, axis=(0, 1, 2), keepdims=True)
        return ((y - mu) * lax.rsqrt(var + EPS) * g.reshape(1, 1, 1, -1)
                + be.reshape(1, 1, 1, -1))

    h = jax.nn.relu(bn(conv(x_nhwc, p["w1"], p["b1"], 1), p["g1"], p["be1"]))
    out = bn(conv(h, p["w2"], p["b2"], 1), p["g2"], p["be2"])
    skip = conv(x_nhwc, p["ws"].reshape(1, 1, *p["ws"].shape), p["bs"], 0)
    return jax.nn.relu(out + skip)


def init_params(key, in_c, hidden_c, out_c):
    ks = jax.random.split(key, 8)

    def uconv(k, shape, fan_in):
        bound = 1.0 / jnp.sqrt(fan_in)
        return jax.random.uniform(k, shape, jnp.float32, -bound, bound)

    p = {
        "w1": uconv(ks[0], (3, 3, in_c, hidden_c), 9 * in_c),
        "b1": uconv(ks[1], (1, hidden_c), 9 * in_c),
        "g1": jax.random.uniform(ks[2], (1, hidden_c), jnp.float32, 0.5, 1.5),
        "be1": 0.1 * jax.random.normal(ks[3], (1, hidden_c), jnp.float32),
        "w2": uconv(ks[4], (3, 3, hidden_c, out_c), 9 * hidden_c),
        "b2": uconv(ks[5], (1, out_c), 9 * hidden_c),
        "g2": jax.random.uniform(ks[6], (1, out_c), jnp.float32, 0.5, 1.5),
        "be2": 0.1 * jax.random.normal(ks[7], (1, out_c), jnp.float32),
    }
    if in_c != out_c:  # use_conv = True
        ks2 = jax.random.split(jax.random.fold_in(key, 99), 2)
        p["ws"] = uconv(ks2[0], (in_c, out_c), in_c)
        p["bs"] = uconv(ks2[1], (1, out_c), in_c)
    else:
        # identity skip expressed as a 1x1 identity conv
        p["ws"] = jnp.eye(in_c, dtype=jnp.float32)
        p["bs"] = jnp.zeros((1, out_c), jnp.float32)
    return p


if __name__ == "__main__":
    # Module config: in_c=4, hidden_c=8, out_c=8 -> use_conv=True (in_c != out_c)
    N, Cin, H, W = 2, 4, 16, 16
    hidden_c, out_c = 8, 8

    key = jax.random.PRNGKey(0)
    kx, kp = jax.random.split(key)
    x_nchw = jax.random.normal(kx, (N, Cin, H, W), jnp.float32)  # PyTorch layout
    params = init_params(kp, Cin, hidden_c, out_c)

    x_nhwc = jnp.transpose(x_nchw, (0, 2, 3, 1))  # NCHW -> NHWC for the kernel

    block = make_resnet_block(params, N, H, W, Cin)  # weight prep hoisted here
    out_nhwc = jax.block_until_ready(block(x_nhwc))

    ref_nhwc = ref_block(x_nhwc, params)
    if not jnp.allclose(out_nhwc, ref_nhwc, rtol=1e-3, atol=1e-3):
        max_err = float(jnp.max(jnp.abs(out_nhwc - ref_nhwc)))
        raise AssertionError(f"mismatch vs reference, max abs err = {max_err}")

    out_nchw = jnp.transpose(out_nhwc, (0, 3, 1, 2))  # back to PyTorch NCHW
    jax.block_until_ready(out_nchw)
    print("KERNEL_OK")
</pallas_src>

<mosaic_0001>
module attributes {stable_mosaic.version = 11 : i64} {
  func.func @resnet_block_kernel(%arg0: memref<32x128xf32, #tpu.memory_space<vmem>>, %arg1: memref<384x128xf32, #tpu.memory_space<vmem>>, %arg2: memref<384x128xf32, #tpu.memory_space<vmem>>, %arg3: memref<128x128xf32, #tpu.memory_space<vmem>>, %arg4: memref<128x8xf32, #tpu.memory_space<vmem>>, %arg5: memref<8x128xf32, #tpu.memory_space<vmem>>, %arg6: memref<8x128xf32, #tpu.memory_space<vmem>>, %arg7: memref<32x128xf32, #tpu.memory_space<vmem>>) attributes {dimension_semantics = [], scalar_prefetch = 0 : i64, scratch_operands = 0 : i64, tpu.core_type = #tpu.core_type<tc>} {
    %c0 = arith.constant 0 : index
    %c0_0 = arith.constant 0 : index
    %0 = vector.load %arg0[%c0, %c0_0] : memref<32x128xf32, #tpu.memory_space<vmem>>, vector<32x128xf32>
    %1 = tpu.iota {dimensions = array<i32: 0>} : vector<32x128xi32>
    %c16_i32 = arith.constant 16 : i32
    %c0_i32 = arith.constant 0 : i32
    %2 = arith.cmpi eq, %c16_i32, %c0_i32 : i32
    %c1_i32 = arith.constant 1 : i32
    %3 = arith.select %2, %c1_i32, %c16_i32 : i32
    %4 = vector.broadcast %3 : i32 to vector<32x128xi32>
    %5 = arith.remsi %1, %4 : vector<32x128xi32>
    %c0_i32_1 = arith.constant 0 : i32
    %6 = vector.broadcast %c0_i32_1 : i32 to vector<32x128xi32>
    %7 = arith.cmpi ne, %5, %6 : vector<32x128xi32>
    %c0_i32_2 = arith.constant 0 : i32
    %8 = vector.broadcast %c0_i32_2 : i32 to vector<32x128xi32>
    %9 = arith.cmpi slt, %5, %8 : vector<32x128xi32>
    %c0_i32_3 = arith.constant 0 : i32
    %10 = arith.cmpi slt, %3, %c0_i32_3 : i32
    %11 = vector.broadcast %10 : i1 to vector<32x128xi1>
    %12 = vector.broadcast %11 : vector<32x128xi1> to vector<32x128xi1>
    %13 = arith.xori %9, %12 : vector<32x128xi1>
    %14 = arith.andi %13, %7 : vector<32x128xi1>
    %15 = vector.broadcast %3 : i32 to vector<32x128xi32>
    %16 = arith.addi %5, %15 : vector<32x128xi32>
    %17 = arith.select %14, %16, %5 : vector<32x128xi1>, vector<32x128xi32>
    %c0_i32_4 = arith.constant 0 : i32
    %18 = vector.broadcast %c0_i32_4 : i32 to vector<32x128xi32>
    %19 = arith.cmpi ne, %17, %18 : vector<32x128xi32>
    %c15_i32 = arith.constant 15 : i32
    %20 = vector.broadcast %c15_i32 : i32 to vector<32x128xi32>
    %21 = arith.cmpi ne, %17, %20 : vector<32x128xi32>
    %c0_5 = arith.constant 0 : index
    %c0_6 = arith.constant 0 : index
    %22 = vector.load %arg4[%c0_5, %c0_6] : memref<128x8xf32, #tpu.memory_space<vmem>>, vector<128x8xf32>
    %c0_7 = arith.constant 0 : index
    %c0_8 = arith.constant 0 : index
    %23 = vector.load %arg5[%c0_7, %c0_8] : memref<8x128xf32, #tpu.memory_space<vmem>>, vector<8x128xf32>
    %c0_9 = arith.constant 0 : index
    %c0_10 = arith.constant 0 : index
    %24 = vector.load %arg6[%c0_9, %c0_10] : memref<8x128xf32, #tpu.memory_space<vmem>>, vector<8x128xf32>
    %c1_i32_11 = arith.constant 1 : i32
    %25 = tpu.dynamic_rotate %0 by %c1_i32_11 dim 0 : vector<32x128xf32>, i32 -> vector<32x128xf32>
    %cst = arith.constant 0.000000e+00 : f32
    %26 = vector.broadcast %cst : f32 to vector<32x128xf32>
    %27 = arith.select %19, %25, %26 : vector<32x128xi1>, vector<32x128xf32>
    %c31_i32 = arith.constant 31 : i32
    %28 = tpu.dynamic_rotate %0 by %c31_i32 dim 0 : vector<32x128xf32>, i32 -> vector<32x128xf32>
    %cst_12 = arith.constant 0.000000e+00 : f32
    %29 = vector.broadcast %cst_12 : f32 to vector<32x128xf32>
    %30 = arith.select %21, %28, %29 : vector<32x128xi1>, vector<32x128xf32>
    %31 = tpu.concatenate %27, %0, %30 in 1 : vector<32x128xf32>, vector<32x128xf32>, vector<32x128xf32> -> vector<32x384xf32>
    %c0_13 = arith.constant 0 : index
    %c0_14 = arith.constant 0 : index
    %32 = vector.load %arg1[%c0_13, %c0_14] : memref<384x128xf32, #tpu.memory_space<vmem>>, vector<384x128xf32>
    %cst_15 = arith.constant dense<0.000000e+00> : vector<32x128xf32>
    %33 = tpu.matmul %31, %32, %cst_15 {dimension_numbers = #tpu.dot_dimension_numbers<[1], [0], [0], [1], [0, 0, 1, 1], [], []>} : vector<32x384xf32>, vector<384x128xf32>, vector<32x128xf32> -> vector<32x128xf32>
    %34 = vector.extract_strided_slice %24 {offsets = [0, 0], sizes = [1, 128], strides = [1, 1]} : vector<8x128xf32> to vector<1x128xf32>
    %35 = vector.extract_strided_slice %24 {offsets = [1, 0], sizes = [1, 128], strides = [1, 1]} : vector<8x128xf32> to vector<1x128xf32>
    %cst_16 = arith.constant dense<0.000000e+00> : vector<128xf32>
    %36 = vector.multi_reduction <add>, %33, %cst_16 [0] : vector<32x128xf32> to vector<128xf32>
    %37 = vector.shape_cast %36 : vector<128xf32> to vector<1x128xf32>
    %38 = arith.mulf %33, %33 : vector<32x128xf32>
    %cst_17 = arith.constant dense<0.000000e+00> : vector<128xf32>
    %39 = vector.multi_reduction <add>, %38, %cst_17 [0] : vector<32x128xf32> to vector<128xf32>
    %40 = vector.shape_cast %39 : vector<128xf32> to vector<1x128xf32>
    %41 = tpu.concatenate %37, %40 in 0 : vector<1x128xf32>, vector<1x128xf32> -> vector<2x128xf32>
    %cst_18 = arith.constant dense<0.000000e+00> : vector<2x8xf32>
    %42 = tpu.matmul %41, %22, %cst_18 {dimension_numbers = #tpu.dot_dimension_numbers<[1], [0], [0], [1], [0, 0, 1, 1], [], []>} : vector<2x128xf32>, vector<128x8xf32>, vector<2x8xf32> -> vector<2x8xf32>
    %cst_19 = arith.constant dense<0.000000e+00> : vector<2x128xf32>
    %43 = tpu.matmul %42, %23, %cst_19 {dimension_numbers = #tpu.dot_dimension_numbers<[1], [0], [0], [1], [0, 0, 1, 1], [], []>} : vector<2x8xf32>, vector<8x128xf32>, vector<2x128xf32> -> vector<2x128xf32>
    %cst_20 = arith.constant 0.001953125 : f32
    %44 = vector.broadcast %cst_20 : f32 to vector<2x128xf32>
    %45 = arith.mulf %43, %44 : vector<2x128xf32>
    %46 = vector.extract_strided_slice %45 {offsets = [0, 0], sizes = [1, 128], strides = [1, 1]} : vector<2x128xf32> to vector<1x128xf32>
    %47 = vector.extract_strided_slice %45 {offsets = [1, 0], sizes = [1, 128], strides = [1, 1]} : vector<2x128xf32> to vector<1x128xf32>
    %48 = arith.mulf %46, %46 : vector<1x128xf32>
    %49 = arith.subf %47, %48 : vector<1x128xf32>
    %cst_21 = arith.constant 9.99999974E-6 : f32
    %50 = vector.broadcast %cst_21 : f32 to vector<1x128xf32>
    %51 = arith.addf %49, %50 : vector<1x128xf32>
    %52 = math.rsqrt %51 : vector<1x128xf32>
    %53 = arith.mulf %34, %52 : vector<1x128xf32>
    %54 = arith.mulf %46, %53 : vector<1x128xf32>
    %55 = arith.subf %35, %54 : vector<1x128xf32>
    %56 = vector.broadcast %53 : vector<1x128xf32> to vector<32x128xf32>
    %57 = arith.mulf %33, %56 : vector<32x128xf32>
    %58 = vector.broadcast %55 : vector<1x128xf32> to vector<32x128xf32>
    %59 = arith.addf %57, %58 : vector<32x128xf32>
    %cst_22 = arith.constant 0.000000e+00 : f32
    %60 = vector.broadcast %cst_22 : f32 to vector<32x128xf32>
    %61 = arith.maximumf %59, %60 : vector<32x128xf32>
    %c1_i32_23 = arith.constant 1 : i32
    %62 = tpu.dynamic_rotate %61 by %c1_i32_23 dim 0 : vector<32x128xf32>, i32 -> vector<32x128xf32>
    %cst_24 = arith.constant 0.000000e+00 : f32
    %63 = vector.broadcast %cst_24 : f32 to vector<32x128xf32>
    %64 = arith.select %19, %62, %63 : vector<32x128xi1>, vector<32x128xf32>
    %c31_i32_25 = arith.constant 31 : i32
    %65 = tpu.dynamic_rotate %61 by %c31_i32_25 dim 0 : vector<32x128xf32>, i32 -> vector<32x128xf32>
    %cst_26 = arith.constant 0.000000e+00 : f32
    %66 = vector.broadcast %cst_26 : f32 to vector<32x128xf32>
    %67 = arith.select %21, %65, %66 : vector<32x128xi1>, vector<32x128xf32>
    %68 = tpu.concatenate %64, %61, %67 in 1 : vector<32x128xf32>, vector<32x128xf32>, vector<32x128xf32> -> vector<32x384xf32>
    %c0_27 = arith.constant 0 : index
    %c0_28 = arith.constant 0 : index
    %69 = vector.load %arg2[%c0_27, %c0_28] : memref<384x128xf32, #tpu.memory_space<vmem>>, vector<384x128xf32>
    %cst_29 = arith.constant dense<0.000000e+00> : vector<32x128xf32>
    %70 = tpu.matmul %68, %69, %cst_29 {dimension_numbers = #tpu.dot_dimension_numbers<[1], [0], [0], [1], [0, 0, 1, 1], [], []>} : vector<32x384xf32>, vector<384x128xf32>, vector<32x128xf32> -> vector<32x128xf32>
    %71 = vector.extract_strided_slice %24 {offsets = [2, 0], sizes = [1, 128], strides = [1, 1]} : vector<8x128xf32> to vector<1x128xf32>
    %72 = vector.extract_strided_slice %24 {offsets = [3, 0], sizes = [1, 128], strides = [1, 1]} : vector<8x128xf32> to vector<1x128xf32>
    %cst_30 = arith.constant dense<0.000000e+00> : vector<128xf32>
    %73 = vector.multi_reduction <add>, %70, %cst_30 [0] : vector<32x128xf32> to vector<128xf32>
    %74 = vector.shape_cast %73 : vector<128xf32> to vector<1x128xf32>
    %75 = arith.mulf %70, %70 : vector<32x128xf32>
    %cst_31 = arith.constant dense<0.000000e+00> : vector<128xf32>
    %76 = vector.multi_reduction <add>, %75, %cst_31 [0] : vector<32x128xf32> to vector<128xf32>
    %77 = vector.shape_cast %76 : vector<128xf32> to vector<1x128xf32>
    %78 = tpu.concatenate %74, %77 in 0 : vector<1x128xf32>, vector<1x128xf32> -> vector<2x128xf32>
    %cst_32 = arith.constant dense<0.000000e+00> : vector<2x8xf32>
    %79 = tpu.matmul %78, %22, %cst_32 {dimension_numbers = #tpu.dot_dimension_numbers<[1], [0], [0], [1], [0, 0, 1, 1], [], []>} : vector<2x128xf32>, vector<128x8xf32>, vector<2x8xf32> -> vector<2x8xf32>
    %cst_33 = arith.constant dense<0.000000e+00> : vector<2x128xf32>
    %80 = tpu.matmul %79, %23, %cst_33 {dimension_numbers = #tpu.dot_dimension_numbers<[1], [0], [0], [1], [0, 0, 1, 1], [], []>} : vector<2x8xf32>, vector<8x128xf32>, vector<2x128xf32> -> vector<2x128xf32>
    %cst_34 = arith.constant 0.001953125 : f32
    %81 = vector.broadcast %cst_34 : f32 to vector<2x128xf32>
    %82 = arith.mulf %80, %81 : vector<2x128xf32>
    %83 = vector.extract_strided_slice %82 {offsets = [0, 0], sizes = [1, 128], strides = [1, 1]} : vector<2x128xf32> to vector<1x128xf32>
    %84 = vector.extract_strided_slice %82 {offsets = [1, 0], sizes = [1, 128], strides = [1, 1]} : vector<2x128xf32> to vector<1x128xf32>
    %85 = arith.mulf %83, %83 : vector<1x128xf32>
    %86 = arith.subf %84, %85 : vector<1x128xf32>
    %cst_35 = arith.constant 9.99999974E-6 : f32
    %87 = vector.broadcast %cst_35 : f32 to vector<1x128xf32>
    %88 = arith.addf %86, %87 : vector<1x128xf32>
    %89 = math.rsqrt %88 : vector<1x128xf32>
    %90 = arith.mulf %71, %89 : vector<1x128xf32>
    %91 = arith.mulf %83, %90 : vector<1x128xf32>
    %92 = arith.subf %72, %91 : vector<1x128xf32>
    %93 = vector.broadcast %90 : vector<1x128xf32> to vector<32x128xf32>
    %94 = arith.mulf %70, %93 : vector<32x128xf32>
    %95 = vector.broadcast %92 : vector<1x128xf32> to vector<32x128xf32>
    %96 = arith.addf %94, %95 : vector<32x128xf32>
    %c0_36 = arith.constant 0 : index
    %c0_37 = arith.constant 0 : index
    %97 = vector.load %arg3[%c0_36, %c0_37] : memref<128x128xf32, #tpu.memory_space<vmem>>, vector<128x128xf32>
    %cst_38 = arith.constant dense<0.000000e+00> : vector<32x128xf32>
    %98 = tpu.matmul %0, %97, %cst_38 {dimension_numbers = #tpu.dot_dimension_numbers<[1], [0], [0], [1], [0, 0, 1, 1], [], []>} : vector<32x128xf32>, vector<128x128xf32>, vector<32x128xf32> -> vector<32x128xf32>
    %99 = vector.extract_strided_slice %24 {offsets = [4, 0], sizes = [1, 128], strides = [1, 1]} : vector<8x128xf32> to vector<1x128xf32>
    %100 = vector.broadcast %99 : vector<1x128xf32> to vector<32x128xf32>
    %101 = arith.addf %98, %100 : vector<32x128xf32>
    %102 = arith.addf %96, %101 : vector<32x128xf32>
    %cst_39 = arith.constant 0.000000e+00 : f32
    %103 = vector.broadcast %cst_39 : f32 to vector<32x128xf32>
    %104 = arith.maximumf %102, %103 : vector<32x128xf32>
    %c0_40 = arith.constant 0 : index
    %c0_41 = arith.constant 0 : index
    %105 = vector.load %arg7[%c0_40, %c0_41] : memref<32x128xf32, #tpu.memory_space<vmem>>, vector<32x128xf32>
    tpu.vector_store %arg7[%c0_40, %c0_41], %104 {strides = array<i32>} : memref<32x128xf32, #tpu.memory_space<vmem>>, vector<32x128xf32>,
    return
  }
}

</mosaic_0001>

<bundles_post_ra>
// kernel: run.1
= control target key start
LH: loop header
LB: loop body
LE: loop exit
PB: predicated region body
PF: predicated region fallthrough
CT: control target
= control target key end

     0   :  { %v30_v28 = vlaneseq  ;;  %vm1520_vm6 = vmmov 0   ;;  %vm375_vm7 = vcmask 1040384   ;;  %vm447_vm8 = vcmask 64512   ;;  %s2245_s1 = inlined_call_operand.vmem [shape: f32[384,128], index: 1, kind: input, shape index: {}]   ;;  %s2246_s0 = inlined_call_operand.vmem [shape: f32[32,128], index: 0, kind: input, shape index: {}]   ;;  %s2247_s4 = inlined_call_operand.vmem [shape: f32[128,8], index: 4, kind: input, shape index: {}]   ;;  %s2248_s5 = inlined_call_operand.vmem [shape: f32[8,128], index: 5, kind: input, shape index: {}]   ;;  %s2249_s2 = inlined_call_operand.vmem [shape: f32[384,128], index: 2, kind: input, shape index: {}]   ;;  %s2250_s6 = inlined_call_operand.vmem [shape: f32[8,128], index: 6, kind: input, shape index: {}]   ;;  %s2251_s3 = inlined_call_operand.vmem [shape: f32[128,128], index: 3, kind: input, shape index: {}]   ;;  %s2252_s7 = inlined_call_operand.vmem [shape: f32[32,128], index: 7, kind: output, shape index: {}]  }
   0x1   :  { %v166_v0 = vld [vmem:[%s2245_s1 + $0xf8] sm:$0xff]  ;;  %v165_v2 = vld [vmem:[%s2245_s1 + $0xf0] sm:$0xff]  ;;  %v164_v5 = vld [vmem:[%s2245_s1 + $0xe8] sm:$0xff] }
   0x2   :  { %v150_v1 = vld [vmem:[%s2245_s1 + $0x78] sm:$0xff]  ;;  %1133 = vmatprep.subr.mxu0 %v166_v0  ;;  %v149_v4 = vld [vmem:[%s2245_s1 + $0x70] sm:$0xff]  ;;  %v148_v7 = vld [vmem:[%s2245_s1 + $0x68] sm:$0xff]  ;;  %v1663_v35 = vshrl.u32 %v30_v28, 7 }
   0x3   :  { %v182_v3 = vld [vmem:[%s2245_s1 + $0x178] sm:$0xff]  ;;  %1134 = vmatpush3.msra.mxu0 %v150_v1  ;;  %v181_v6 = vld [vmem:[%s2245_s1 + $0x170] sm:$0xff]  ;;  %v180_v8 = vld [vmem:[%s2245_s1 + $0x168] sm:$0xff] }
   0x4   :  { %1319 = vmatprep.subr.mxu1 %v182_v3  ;;  %1135 = vmatprep.subr.mxu0 %v165_v2  ;;  %v163_v9 = vld [vmem:[%s2245_s1 + $0xe0] sm:$0xff]  ;;  %v162_v12 = vld [vmem:[%s2245_s1 + $0xd8] sm:$0xff]  ;;  %v161_v15 = vld [vmem:[%s2245_s1 + $0xd0] sm:$0xff]  ;;  %v32_v45 = vadd.s32 8, %v1663_v35  ;;  %v39_v51 = vand.u32 15, %v1663_v35  ;;  %vm113_vm0 = vcmp.lt.s32.totalorder %v1663_v35, 1 }
   0x5   :  { %1320 = vmatpush3.msra.mxu1 %v182_v3  ;;  %1136 = vmatpush3.msra.mxu0 %v149_v4  ;;  %v147_v10 = vld [vmem:[%s2245_s1 + $0x60] sm:$0xff]  ;;  %v146_v13 = vld [vmem:[%s2245_s1 + $0x58] sm:$0xff]  ;;  %v145_v16 = vld [vmem:[%s2245_s1 + $0x50] sm:$0xff]  ;;  %vm126_vm1 = vcmp.lt.s32.totalorder %v1663_v35, 7  ;;  %v34_v60 = vadd.s32 24, %v1663_v35  ;;  %v33_v3 = vadd.s32 16, %v1663_v35 }
   0x6   :  { %1321 = vmatprep.subr.mxu1 %v181_v6  ;;  %1137 = vmatprep.subr.mxu0 %v164_v5  ;;  %v179_v11 = vld [vmem:[%s2245_s1 + $0x160] sm:$0xff]  ;;  %v178_v14 = vld [vmem:[%s2245_s1 + $0x158] sm:$0xff]  ;;  %v177_v17 = vld [vmem:[%s2245_s1 + $0x150] sm:$0xff]  ;;  %v46_v58 = vand.u32 15, %v32_v45  ;;  %vm1735_vm2 = vcmp.ne.s32.totalorder %v39_v51, 0 }
   0x7   :  { %1322 = vmatpush3.msra.mxu1 %v181_v6  ;;  %1138 = vmatpush3.msra.mxu0 %v148_v7  ;;  %v160_v18 = vld [vmem:[%s2245_s1 + $0xc8] sm:$0xff]  ;;  %v159_v21 = vld [vmem:[%s2245_s1 + $0xc0] sm:$0xff]  ;;  %v158_v24 = vld [vmem:[%s2245_s1 + $0xb8] sm:$0xff]  ;;  %v60_v7 = vand.u32 15, %v34_v60 }
   0x8   :  { %1323 = vmatprep.subr.mxu1 %v180_v8  ;;  %1139 = vmatprep.subr.mxu0 %v163_v9  ;;  %v144_v19 = vld [vmem:[%s2245_s1 + $0x48] sm:$0xff]  ;;  %v143_v22 = vld [vmem:[%s2245_s1 + $0x40] sm:$0xff]  ;;  %v142_v25 = vld [vmem:[%s2245_s1 + $0x38] sm:$0xff]  ;;  %vm1749_vm3 = vcmp.ne.s32.totalorder %v46_v58, 15 }
   0x9   :  { %1324 = vmatpush3.msra.mxu1 %v180_v8  ;;  %1140 = vmatpush3.msra.mxu0 %v147_v10  ;;  %v176_v20 = vld [vmem:[%s2245_s1 + $0x148] sm:$0xff]  ;;  %v175_v23 = vld [vmem:[%s2245_s1 + $0x140] sm:$0xff]  ;;  %v174_v26 = vld [vmem:[%s2245_s1 + $0x138] sm:$0xff]  ;;  %v53_v10 = vand.u32 15, %v33_v3  ;;  %vm1765_vm4 = vcmp.ne.s32.totalorder %v60_v7, 15 }
   0xa   :  { %1325 = vmatprep.subr.mxu1 %v179_v11  ;;  %1141 = vmatprep.subr.mxu0 %v162_v12  ;;  %v157_v27 = vld [vmem:[%s2245_s1 + $0xb0] sm:$0xff]  ;;  %v156_v31 = vld [vmem:[%s2245_s1 + $0xa8] sm:$0xff]  ;;  %v155_v34 = vld [vmem:[%s2245_s1 + $0xa0] sm:$0xff] }
   0xb   :  { %1326 = vmatpush3.msra.mxu1 %v179_v11  ;;  %1142 = vmatpush3.msra.mxu0 %v146_v13  ;;  %v141_v29 = vld [vmem:[%s2245_s1 + $0x30] sm:$0xff]  ;;  %v140_v32 = vld [vmem:[%s2245_s1 + $0x28] sm:$0xff]  ;;  %v139_v36 = vld [vmem:[%s2245_s1 + $0x20] sm:$0xff]  ;;  %vm1772_vm5 = vcmp.ne.s32.totalorder %v53_v10, 0 }
   0xc   :  { %1327 = vmatprep.subr.mxu1 %v178_v14  ;;  %1143 = vmatprep.subr.mxu0 %v161_v15  ;;  %v173_v30 = vld [vmem:[%s2245_s1 + $0x130] sm:$0xff]  ;;  %v172_v33 = vld [vmem:[%s2245_s1 + $0x128] sm:$0xff]  ;;  %v171_v37 = vld [vmem:[%s2245_s1 + $0x120] sm:$0xff] }
   0xd   :  { %1328 = vmatpush3.msra.mxu1 %v178_v14  ;;  %1144 = vmatpush3.msra.mxu0 %v145_v16  ;;  %v154_v38 = vld [vmem:[%s2245_s1 + $0x98] sm:$0xff]  ;;  %v1683_v41 = vld [vmem:[%s2246_s0] sm:$0xff]  ;;  %v153_v43 = vld [vmem:[%s2245_s1 + $0x90] sm:$0xff] }
   0xe   :  { %1329 = vmatprep.subr.mxu1 %v177_v17  ;;  %1145 = vmatprep.subr.mxu0 %v160_v18  ;;  %v138_v39 = vld [vmem:[%s2245_s1 + $0x18] sm:$0xff]  ;;  %v1696_v44 = vld [vmem:[%s2246_s0 + $0x8] sm:$0xff]  ;;  %v137_v46 = vld [vmem:[%s2245_s1 + $0x10] sm:$0xff]  ;;  %v109_v50 = vrot.slane %v1683_v41, 7  ;;  %v122_v55 = vrot.slane %v1683_v41, 1 }
   0xf   :  { %1330 = vmatpush3.msra.mxu1 %v177_v17  ;;  %1146 = vmatpush3.msra.mxu0 %v144_v19  ;;  %v170_v40 = vld [vmem:[%s2245_s1 + $0x118] sm:$0xff]  ;;  %v169_v47 = vld [vmem:[%s2245_s1 + $0x110] sm:$0xff]  ;;  %v152_v49 = vld [vmem:[%s2245_s1 + $0x88] sm:$0xff]  ;;  %v123_v56 = vrot.slane %v1696_v44, 1  ;;  %v110_v2 = vrot.slane %v1696_v44, 7  ;;  %v1519_v17 = vmov 0.0  }
  0x10   :  { %1331 = vmatprep.subr.mxu1 %v176_v20  ;;  %1147 = vmatprep.subr.mxu0 %v159_v21  ;;  %v1688_v42 = vld [vmem:[%s2246_s0 + $0x18] sm:$0xff]  ;;  %v1708_v48 = vld [vmem:[%s2246_s0 + $0x10] sm:$0xff]  ;;  %v136_v53 = vld [vmem:[%s2245_s1 + $0x8] sm:$0xff] }
  0x11   :  { %1332 = vmatpush3.msra.mxu1 %v176_v20  ;;  %1148 = vmatpush3.msra.mxu0 %v143_v22  ;;  %v112_v52 = vrot.slane %v1688_v42, 7  ;;  %v168_v54 = vld [vmem:[%s2245_s1 + $0x108] sm:$0xff]  ;;  %v151_v57 = vld [vmem:[%s2245_s1 + $0x80] sm:$0xff]  ;;  %v124_v59 = vrot.slane %v1708_v48, 1  ;;  %v125_v62 = vrot.slane %v1688_v42, 1  ;;  %v129_v4 = vsel %vm126_vm1, %v122_v55, %v123_v56  ;;  %v1789_v18 = vld [vmem:[%s2247_s4 + $0x78] sm:$0xff] }
  0x12   :  { %1333 = vmatprep.subr.mxu1 %v175_v23  ;;  %1149 = vmatprep.subr.mxu0 %v158_v24  ;;  %v135_v61 = vld [vmem:[%s2245_s1] sm:$0xff]  ;;  %v116_v9 = vsel %vm113_vm0, %v109_v50, %v110_v2  ;;  %v111_v11 = vrot.slane %v1708_v48, 7  ;;  %v1797_v19 = vld [vmem:[%s2247_s4 + $0x70] sm:$0xff]  ;;  %v1804_v20 = vld [vmem:[%s2247_s4 + $0x68] sm:$0xff] }
  0x13   :  { %1334 = vmatpush3.msra.mxu1 %v175_v23  ;;  %1150 = vmatpush3.msra.mxu0 %v142_v25  ;;  %v117_v0 = vsel %vm113_vm0, %v112_v52, %v109_v50  ;;  %v167_v1 = vld [vmem:[%s2245_s1 + $0x100] sm:$0xff]  ;;  %v128_v6 = vsel %vm126_vm1, %v123_v56, %v124_v59  ;;  %v127_v8 = vsel %vm126_vm1, %v124_v59, %v125_v62  ;;  %v1818_v22 = vld [vmem:[%s2247_s4 + $0x58] sm:$0xff]  ;;  %v1825_v23 = vld [vmem:[%s2247_s4 + $0x50] sm:$0xff] }
  0x14   :  { %1335 = vmatprep.subr.mxu1 %v174_v26  ;;  %1151 = vmatprep.subr.mxu0 %v157_v27  ;;  %v130_v13 = vsel %vm126_vm1, %v125_v62, %v122_v55  ;;  %v115_v15 = vsel %vm113_vm0, %v110_v2, %v111_v11  ;;  %v114_v16 = vsel %vm113_vm0, %v111_v11, %v112_v52  ;;  %v1811_v21 = vld [vmem:[%s2247_s4 + $0x60] sm:$0xff]  ;;  %v1832_v24 = vld [vmem:[%s2247_s4 + $0x48] sm:$0xff]  ;;  %v1853_v27 = vld [vmem:[%s2247_s4 + $0x30] sm:$0xff] }
  0x15   :  { %1336 = vmatpush3.msra.mxu1 %v174_v26  ;;  %1152 = vmatpush3.msra.mxu0 %v141_v29  ;;  %v1839_v25 = vld [vmem:[%s2247_s4 + $0x40] sm:$0xff]  ;;  %v1846_v26 = vld [vmem:[%s2247_s4 + $0x38] sm:$0xff]  ;;  %v1860_v28 = vld [vmem:[%s2247_s4 + $0x28] sm:$0xff] }
  0x16   :  { %1337 = vmatprep.subr.mxu1 %v173_v30  ;;  %1153 = vmatprep.subr.mxu0 %v156_v31  ;;  %v1867_v29 = vld [vmem:[%s2247_s4 + $0x20] sm:$0xff]  ;;  %v1879_v31 = vld [vmem:[%s2247_s4 + $0x10] sm:$0xff] }
  0x17   :  { %1338 = vmatpush3.msra.mxu1 %v173_v30  ;;  %1154 = vmatpush3.msra.mxu0 %v140_v32  ;;  %v1873_v30 = vld [vmem:[%s2247_s4 + $0x18] sm:$0xff]  ;;  %v1890_v32 = vld [vmem:[%s2247_s4 + $0x8] sm:$0xff] }
  0x18   :  { %1339 = vmatprep.subr.mxu1 %v172_v33  ;;  %1155 = vmatprep.subr.mxu0 %v155_v34  ;;  %v1905_v34 = vld [vmem:[%s2248_s5] sm:$0xff] }
  0x19   :  { %1340 = vmatpush3.msra.mxu1 %v172_v33  ;;  %1156 = vmatpush3.msra.mxu0 %v139_v36  ;;  %v1897_v33 = vld [vmem:[%s2247_s4] sm:$0xff] }
  0x1a   :  { %1341 = vmatprep.subr.mxu1 %v171_v37  ;;  %1157 = vmatprep.subr.mxu0 %v154_v38 }
  0x1b   :  { %1342 = vmatpush3.msra.mxu1 %v171_v37  ;;  %1158 = vmatpush3.msra.mxu0 %v138_v39 }
  0x1c   :  { %1343 = vmatprep.subr.mxu1 %v170_v40  ;;  %1159 = vmatprep.subr.mxu0 %v153_v43 }
  0x1d   :  { %1344 = vmatpush3.msra.mxu1 %v170_v40  ;;  %1160 = vmatpush3.msra.mxu0 %v137_v46 }
  0x1e   :  { %1345 = vmatprep.subr.mxu1 %v169_v47  ;;  %1161 = vmatprep.subr.mxu0 %v152_v49 }
  0x1f   :  { %1346 = vmatpush3.msra.mxu1 %v169_v47  ;;  %1162 = vmatpush3.msra.mxu0 %v136_v53 }
  0x20   :  { %1347 = vmatprep.subr.mxu1 %v168_v54  ;;  %1163 = vmatprep.subr.mxu0 %v151_v57 }
  0x21   :  { %247 = vmatprep.mubr.f32.mxu0 %v1683_v41  ;;  %1164 = vmatpush3.msra.mxu0 %v135_v61 }
  0x22   :  { %1348 = vmatpush3.msra.mxu1 %v168_v54  ;;  %1123 = vmatmul.mubr.msk.f32.vlgmr.msra.gmra.mxu0 %vm1735_vm2, %v117_v0 }
  0x23   :  { %1349 = vmatprep.subr.mxu1 %v167_v1  ;;  %1351 = vmatprep.mubr.f32.mxu1 %v129_v4 }
  0x24   :  { %1350 = vmatpush3.msra.mxu1 %v167_v1  ;;  %252 = vmatprep.mubr.f32.mxu0 %v1696_v44 }
  0x25   :  { %1352 = vmatmul.mubr.msk.f32.vlgmr.msra.gmra.mxu1 %vm1749_vm3, %v128_v6  ;;  %1357 = vmatprep.subr.mxu1 %v1519_v17 }
  0x26   :  { %1354 = vmatprep.mubr.f32.mxu1 %v127_v8  ;;  %253 = vmatmul.mubr.f32.gmra.mxu0 %v116_v9 }
  0x27   :  { %257 = vmatprep.mubr.f32.mxu0 %v1708_v48  ;;  %1392 = vmatprep.subr.mxu0 %v1519_v17 }
  0x28   :  { %1358 = vmatpush3.msra.mxu1 %v1789_v18  ;;  %1393 = vmatpush3.msra.mxu0 %v1905_v34 }
  0x29   :  { %1355 = vmatmul.mubr.msk.f32.gmra.mxu1 %vm1765_vm4, %v130_v13  ;;  %1359 = vmatprep.subr.mxu1 %v1519_v17 }
  0x2a   :  { %1124 = vmatmul.mubr.msk.f32.gmra.mxu0 %vm1772_vm5, %v115_v15  ;;  %1360 = vmatpush3.msra.mxu1 %v1797_v19 }
  0x2b   :  { %262 = vmatprep.mubr.f32.mxu0 %v1688_v42  ;;  %1361 = vmatprep.subr.mxu1 %v1519_v17 }
  0x2c   :  { %1362 = vmatpush3.msra.mxu1 %v1804_v20  ;;  %1389 = vmatprep.mubr.msk.f32.mxu1 %vm1520_vm6, %v1519_v17 }
  0x2d   :  { %1363 = vmatprep.subr.mxu1 %v1519_v17 }
  0x2e   :  { %263 = vmatmul.mubr.f32.gmra.mxu0 %v114_v16  ;;  %1364 = vmatpush3.msra.mxu1 %v1811_v21 }
  0x2f   :  { %1365 = vmatprep.subr.mxu1 %v1519_v17  ;;  %1394 = vmatprep.mubr.msk.f32.mxu0 %vm1520_vm6, %v1519_v17 }
  0x30   :  { %1366 = vmatpush3.msra.mxu1 %v1818_v22 }
  0x31   :  { %1367 = vmatprep.subr.mxu1 %v1519_v17 }
  0x32   :  { %1368 = vmatpush3.msra.mxu1 %v1825_v23 }
  0x33   :  { %1369 = vmatprep.subr.mxu1 %v1519_v17 }
  0x34   :  { %1370 = vmatpush3.msra.mxu1 %v1832_v24 }
  0x35   :  { %1371 = vmatprep.subr.mxu1 %v1519_v17 }
  0x36   :  { %1372 = vmatpush3.msra.mxu1 %v1839_v25 }
  0x37   :  { %1373 = vmatprep.subr.mxu1 %v1519_v17 }
  0x38   :  { %1374 = vmatpush3.msra.mxu1 %v1846_v26 }
  0x39   :  { %1375 = vmatprep.subr.mxu1 %v1519_v17 }
  0x3a   :  { %1376 = vmatpush3.msra.mxu1 %v1853_v27 }
  0x3b   :  { %1377 = vmatprep.subr.mxu1 %v1519_v17 }
  0x3c   :  { %1378 = vmatpush3.msra.mxu1 %v1860_v28 }
  0x3d   :  { %1379 = vmatprep.subr.mxu1 %v1519_v17 }
  0x3e   :  { %1380 = vmatpush3.msra.mxu1 %v1867_v29 }
  0x3f   :  { %1381 = vmatprep.subr.mxu1 %v1519_v17 }
  0x40   :  { %1382 = vmatpush3.msra.mxu1 %v1873_v30 }
  0x41   :  { %1383 = vmatprep.subr.mxu1 %v1519_v17 }
  0x42   :  { %1384 = vmatpush3.msra.mxu1 %v1879_v31 }
  0x43   :  { %1385 = vmatprep.subr.mxu1 %v1519_v17 }
  0x44   :  { %1386 = vmatpush3.msra.mxu1 %v1890_v32 }
  0x45   :  { %1387 = vmatprep.subr.mxu1 %v1519_v17 }
  0x46   :  { %1388 = vmatpush3.msra.mxu1 %v1897_v33 }
  0xe2   :  { %v1165_v36 = vpop.f32.mrf.mxu0 }
  0xe4   :  { %v1166_v37 = vpop.f32.mrf.mxu0 }
  0xe5   :  { %v1353_v38 = vpop.f32.mrf.mxu1  ;;  %v1167_v46 = vadd.f32 %v1166_v37, %v1165_v36 }
  0xe6   :  { %v1168_v39 = vpop.f32.mrf.mxu0 }
  0xe7   :  { %v334_v40 = vpop.f32.mrf.mxu1 }
  0xe8   :  { %v1169_v43 = vpop.f32.mrf.mxu0  ;;  %v1910_v53 = vadd.f32 %v1167_v46, %v334_v40 }
  0xe9   :  { %v1356_v45 = vpop.f32.mrf.mxu1  ;;  %v1170_v47 = vadd.f32 %v1169_v43, %v1168_v39 }
  0xea   :  { %v1171_v49 = vpop.f32.mrf.mxu0  ;;  %v362_v59 = vmul.f32 %v1910_v53, %v1910_v53 }
  0xeb   :  { %v1908_v50 = vadd.f32 %v1353_v38, %v1170_v47  ;;  %v344_v52 = vpop.f32.mrf.mxu1  ;;  %v613_v47 = vld [vmem:[%s2249_s2 + $0xf8] sm:$0xff] }
  0xec   :  { %v1172_v51 = vpop.f32.mrf.mxu0  ;;  %1216 = vmatprep.subr.mxu1 %v613_v47  ;;  %v602_v47 = vld [vmem:[%s2249_s2 + $0xa0] sm:$0xff] }
  0xed   :  { %v1173_v54 = vadd.f32 %v1172_v51, %v1171_v49  ;;  %v363_v56 = vmul.f32 %v1908_v50, %v1908_v50  ;;  %v353_v60 = vadd.f32 %v1908_v50, %v1910_v53  ;;  %v597_v49 = vld [vmem:[%s2249_s2 + $0x78] sm:$0xff] }
  0xee   :  { %v1174_v55 = vpop.f32.mrf.mxu0  ;;  %v629_v51 = vld [vmem:[%s2249_s2 + $0x178] sm:$0xff] }
  0xef   :  { %v1914_v57 = vadd.f32 %v1173_v54, %v344_v52  ;;  %v366_v1 = vadd.f32 %v363_v56, %v362_v59  ;;  %1397 = vmatprep.subr.mxu0 %v629_v51  ;;  %v612_v52 = vld [vmem:[%s2249_s2 + $0xf0] sm:$0xff]  ;;  %v611_v56 = vld [vmem:[%s2249_s2 + $0xe8] sm:$0xff] }
  0xf0   :  { %v1175_v58 = vpop.f32.mrf.mxu0  ;;  %v596_v54 = vld [vmem:[%s2249_s2 + $0x70] sm:$0xff]  ;;  %v627_v59 = vld [vmem:[%s2249_s2 + $0x168] sm:$0xff] }
  0xf1   :  { %v364_v61 = vmul.f32 %v1914_v57, %v1914_v57  ;;  %v1176_v62 = vadd.f32 %v1175_v58, %v1174_v55  ;;  %v354_v0 = vadd.f32 %v353_v60, %v1914_v57  ;;  %v628_v55 = vld [vmem:[%s2249_s2 + $0x170] sm:$0xff]  ;;  %v595_v58 = vld [vmem:[%s2249_s2 + $0x68] sm:$0xff]  ;;  %v610_v60 = vld [vmem:[%s2249_s2 + $0xe0] sm:$0xff] }
  0xf3   :  { %v1923_v2 = vadd.f32 %v1356_v45, %v1176_v62  ;;  %v367_v3 = vadd.f32 %v366_v1, %v364_v61  ;;  %v594_v61 = vld [vmem:[%s2249_s2 + $0x60] sm:$0xff]  ;;  %v593_v1 = vld [vmem:[%s2249_s2 + $0x58] sm:$0xff] }
  0xf4   :  { %v626_v62 = vld [vmem:[%s2249_s2 + $0x160] sm:$0xff] }
  0xf5   :  { %v355_v4 = vadd.f32 %v354_v0, %v1923_v2  ;;  %v365_v6 = vmul.f32 %v1923_v2, %v1923_v2  ;;  %v609_v0 = vld [vmem:[%s2249_s2 + $0xd8] sm:$0xff] }
  0xf7   :  { %v356_v7 = vrot.slane %v355_v4, 4  ;;  %v368_v8 = vadd.f32 %v367_v3, %v365_v6  ;;  %v625_v3 = vld [vmem:[%s2249_s2 + $0x158] sm:$0xff]  ;;  %v592_v6 = vld [vmem:[%s2249_s2 + $0x50] sm:$0xff] }
  0xf9   :  { %v357_v9 = vadd.f32 %v356_v7, %v355_v4  ;;  %v369_v10 = vrot.slane %v368_v8, 4  ;;  %v608_v4 = vld [vmem:[%s2249_s2 + $0xd0] sm:$0xff] }
  0xfa   :  { %v624_v7 = vld [vmem:[%s2249_s2 + $0x150] sm:$0xff] }
  0xfb   :  { %v358_v11 = vrot.slane %v357_v9, 2  ;;  %v370_v13 = vadd.f32 %v369_v10, %v368_v8  ;;  %v607_v8 = vld [vmem:[%s2249_s2 + $0xc8] sm:$0xff] }
  0xfc   :  { %v623_v10 = vld [vmem:[%s2249_s2 + $0x148] sm:$0xff] }
  0xfd   :  { %v359_v15 = vadd.f32 %v358_v11, %v357_v9  ;;  %v371_v16 = vrot.slane %v370_v13, 2  ;;  %v591_v9 = vld [vmem:[%s2249_s2 + $0x48] sm:$0xff]  ;;  %v606_v11 = vld [vmem:[%s2249_s2 + $0xc0] sm:$0xff] }
  0xff   :  { %v360_v36 = vrot.slane %v359_v15, 1  ;;  %v372_v37 = vadd.f32 %v371_v16, %v370_v13  ;;  %v590_v13 = vld [vmem:[%s2249_s2 + $0x40] sm:$0xff]  ;;  %v605_v16 = vld [vmem:[%s2249_s2 + $0xb8] sm:$0xff] }
 0x101   :  { %v373_v38 = vrot.slane %v372_v37, 1  ;;  %v361_v39 = vadd.f32 %v360_v36, %v359_v15  ;;  %v622_v15 = vld [vmem:[%s2249_s2 + $0x140] sm:$0xff]  ;;  %v589_v36 = vld [vmem:[%s2249_s2 + $0x38] sm:$0xff] }
 0x103   :  { %v374_v40 = vadd.f32 %v373_v38, %v372_v37  ;;  %v621_v37 = vld [vmem:[%s2249_s2 + $0x138] sm:$0xff]  ;;  %v604_v38 = vld [vmem:[%s2249_s2 + $0xb0] sm:$0xff] }
 0x105   :  { %v376_v43 = vsel %vm375_vm7, %v361_v39, %v374_v40  ;;  %v588_v39 = vld [vmem:[%s2249_s2 + $0x30] sm:$0xff] }
 0x106   :  { %1390 = vmatmul.mubr.f32.vlgmr.msra.gmra.mxu1 %v376_v43  ;;  %v620_v40 = vld [vmem:[%s2249_s2 + $0x130] sm:$0xff]  ;;  %v603_v43 = vld [vmem:[%s2249_s2 + $0xa8] sm:$0xff] }
 0x107   :  { %1217 = vmatpush3.msra.mxu1 %v597_v49  ;;  %v586_v49 = vld [vmem:[%s2249_s2 + $0x20] sm:$0xff] }
 0x108   :  { %1218 = vmatprep.subr.mxu1 %v612_v52  ;;  %v601_v52 = vld [vmem:[%s2249_s2 + $0x98] sm:$0xff] }
 0x109   :  { %1219 = vmatpush3.msra.mxu1 %v596_v54  ;;  %v585_v54 = vld [vmem:[%s2249_s2 + $0x18] sm:$0xff] }
 0x10a   :  { %1220 = vmatprep.subr.mxu1 %v611_v56  ;;  %v600_v56 = vld [vmem:[%s2249_s2 + $0x90] sm:$0xff] }
 0x10b   :  { %1221 = vmatpush3.msra.mxu1 %v595_v58  ;;  %v584_v58 = vld [vmem:[%s2249_s2 + $0x10] sm:$0xff] }
 0x10c   :  { %1222 = vmatprep.subr.mxu1 %v610_v60  ;;  %v599_v60 = vld [vmem:[%s2249_s2 + $0x88] sm:$0xff] }
 0x10d   :  { %1223 = vmatpush3.msra.mxu1 %v594_v61  ;;  %v583_v61 = vld [vmem:[%s2249_s2 + $0x8] sm:$0xff] }
 0x10e   :  { %1224 = vmatprep.subr.mxu1 %v609_v0  ;;  %v598_v0 = vld [vmem:[%s2249_s2 + $0x80] sm:$0xff] }
 0x10f   :  { %1225 = vmatpush3.msra.mxu1 %v593_v1  ;;  %v582_v1 = vld [vmem:[%s2249_s2] sm:$0xff] }
 0x110   :  { %1226 = vmatprep.subr.mxu1 %v608_v4 }
 0x111   :  { %1227 = vmatpush3.msra.mxu1 %v592_v6 }
 0x112   :  { %1228 = vmatprep.subr.mxu1 %v607_v8 }
 0x113   :  { %1229 = vmatpush3.msra.mxu1 %v591_v9 }
 0x114   :  { %1230 = vmatprep.subr.mxu1 %v606_v11 }
 0x115   :  { %1231 = vmatpush3.msra.mxu1 %v590_v13 }
 0x116   :  { %1232 = vmatprep.subr.mxu1 %v605_v16 }
 0x117   :  { %1233 = vmatpush3.msra.mxu1 %v589_v36  ;;  %v540_v36 = vsub.s32 0, %v1663_v35 }
 0x118   :  { %1234 = vmatprep.subr.mxu1 %v604_v38 }
 0x119   :  { %1235 = vmatpush3.msra.mxu1 %v588_v39 }
 0x11a   :  { %1236 = vmatprep.subr.mxu1 %v603_v43  ;;  %v548_v43 = vsub.s32 1, %v1663_v35 }
 0x1c6   :  { %v443_v45 = vpop.f32.mrf.mxu1 }
 0x1c7   :  { %1395 = vmatmul.mubr.msk.f32.vlgmr.msra.gmra.mxu0 %vm447_vm8, %v443_v45  ;;  %v587_v45 = vld [vmem:[%s2249_s2 + $0x28] sm:$0xff] }
 0x1c8   :  { %v1391_v46 = vpop.f32.mrf.mxu1  ;;  %1398 = vmatpush3.msra.mxu0 %v629_v51  ;;  %1237 = vmatpush3.msra.mxu1 %v587_v45  ;;  %v618_v51 = vld [vmem:[%s2249_s2 + $0x120] sm:$0xff] }
 0x1c9   :  { %1399 = vmatprep.subr.mxu0 %v628_v55  ;;  %v619_v46 = vld [vmem:[%s2249_s2 + $0x128] sm:$0xff]  ;;  %1238 = vmatprep.subr.mxu1 %v602_v47 }
 0x1ca   :  { %1400 = vmatpush3.msra.mxu0 %v628_v55  ;;  %1239 = vmatpush3.msra.mxu1 %v586_v49  ;;  %v617_v55 = vld [vmem:[%s2249_s2 + $0x118] sm:$0xff] }
 0x1cb   :  { %1401 = vmatprep.subr.mxu0 %v627_v59  ;;  %1240 = vmatprep.subr.mxu1 %v601_v52 }
 0x1cc   :  { %1402 = vmatpush3.msra.mxu0 %v627_v59  ;;  %v616_v59 = vld [vmem:[%s2249_s2 + $0x110] sm:$0xff]  ;;  %1241 = vmatpush3.msra.mxu1 %v585_v54 }
 0x1cd   :  { %1403 = vmatprep.subr.mxu0 %v626_v62  ;;  %1242 = vmatprep.subr.mxu1 %v600_v56 }
 0x1ce   :  { %1404 = vmatpush3.msra.mxu0 %v626_v62  ;;  %1243 = vmatpush3.msra.mxu1 %v584_v58  ;;  %v615_v62 = vld [vmem:[%s2249_s2 + $0x108] sm:$0xff] }
 0x1cf   :  { %1405 = vmatprep.subr.mxu0 %v625_v3  ;;  %1244 = vmatprep.subr.mxu1 %v599_v60 }
 0x1d0   :  { %1406 = vmatpush3.msra.mxu0 %v625_v3  ;;  %1245 = vmatpush3.msra.mxu1 %v583_v61  ;;  %v614_v3 = vld [vmem:[%s2249_s2 + $0x100] sm:$0xff] }
 0x1d1   :  { %1407 = vmatprep.subr.mxu0 %v624_v7  ;;  %1246 = vmatprep.subr.mxu1 %v598_v0 }
 0x1d2   :  { %1408 = vmatpush3.msra.mxu0 %v624_v7  ;;  %1247 = vmatpush3.msra.mxu1 %v582_v1 }
 0x1d3   :  { %1409 = vmatprep.subr.mxu0 %v623_v10  ;;  %1435 = vmatprep.subr.mxu1 %v1519_v17 }
 0x1d4   :  { %1410 = vmatpush3.msra.mxu0 %v623_v10 }
 0x1d5   :  { %1411 = vmatprep.subr.mxu0 %v622_v15 }
 0x1d6   :  { %1412 = vmatpush3.msra.mxu0 %v622_v15  ;;  %v2079_v15 = vld [vmem:[%s2250_s6] sm:$0xff] }
 0x1d7   :  { %1413 = vmatprep.subr.mxu0 %v621_v37 }
 0x1d8   :  { %1414 = vmatpush3.msra.mxu0 %v621_v37 }
 0x1d9   :  { %1415 = vmatprep.subr.mxu0 %v620_v40 }
 0x1da   :  { %1416 = vmatpush3.msra.mxu0 %v620_v40 }
 0x1db   :  { %1417 = vmatprep.subr.mxu0 %v619_v46 }
 0x1dc   :  { %1418 = vmatpush3.msra.mxu0 %v619_v46 }
 0x1dd   :  { %1419 = vmatprep.subr.mxu0 %v618_v51 }
 0x1de   :  { %1420 = vmatpush3.msra.mxu0 %v618_v51 }
 0x1df   :  { %1421 = vmatprep.subr.mxu0 %v617_v55 }
 0x1e0   :  { %1422 = vmatpush3.msra.mxu0 %v617_v55 }
 0x1e1   :  { %1423 = vmatprep.subr.mxu0 %v616_v59 }
 0x1e2   :  { %1424 = vmatpush3.msra.mxu0 %v616_v59 }
 0x1e3   :  { %1425 = vmatprep.subr.mxu0 %v615_v62 }
 0x1e4   :  { %1426 = vmatpush3.msra.mxu0 %v615_v62 }
 0x1e5   :  { %1427 = vmatprep.subr.mxu0 %v614_v3 }
 0x1e6   :  { %1428 = vmatpush3.msra.mxu0 %v614_v3 }
 0x1e7   :  { %1470 = vmatprep.subr.mxu0 %v1519_v17 }
 0x287   :  { %v517_v4 = vpop.f32.mrf.mxu0 }
 0x288   :  { %v521_v6 = vmul.f32 0.001953125, %v517_v4 }
 0x289   :  { %v1396_v7 = vpop.f32.mrf.mxu0 }
 0x28a   :  { %v522_v8 = vmul.f32 %v521_v6, %v521_v6 }
 0x28c   :  { %v524_v9 = vrot.slane %v522_v8, 7 }
 0x28e   :  { %v526_v10 = vsub.f32 %v521_v6, %v524_v9 }
 0x290   :  { %v527_v11 = vadd.f32 1e-05, %v526_v10 }
 0x292   :  { %1515 = vrsqrt.f32 %v527_v11 }
 0x29f   :  { %v1516_v13 = vpop.eup %1515 }
 0x2a0   :  { %v530_v16 = vrot.slane %v1516_v13, 1 }
 0x2a2   :  { %v532_v37 = vmul.f32 %v530_v16, %v2079_v15 }
 0x2a4   :  { %v533_v38 = vmul.f32 %v532_v37, %v521_v6  ;;  %v541_v39 = vrot.slane %v532_v37, %v540_v36 }
 0x2a6   :  { %v535_v40 = vrot.slane %v533_v38, 7  ;;  %v544_v46 = vmul.f32 %v541_v39, %v1914_v57  ;;  %v545_v47 = vmul.f32 %v541_v39, %v1923_v2  ;;  %v542_v51 = vmul.f32 %v541_v39, %v1910_v53 }
 0x2a7   :  { %v543_v52 = vmul.f32 %v541_v39, %v1908_v50 }
 0x2a8   :  { %v537_v45 = vsub.f32 %v2079_v15, %v535_v40 }
 0x2aa   :  { %v549_v49 = vrot.slane %v537_v45, %v548_v43 }
 0x2ac   :  { %v550_v54 = vadd.f32 %v549_v49, %v542_v51  ;;  %v553_v55 = vadd.f32 %v549_v49, %v545_v47  ;;  %v551_v56 = vadd.f32 %v549_v49, %v543_v52  ;;  %v552_v58 = vadd.f32 %v549_v49, %v544_v46 }
 0x2ae   :  { %v554_v59 = vmax.f32 %v550_v54, 0.0  ;;  %v557_v60 = vmax.f32 %v553_v55, 0.0  ;;  %v555_v61 = vmax.f32 %v551_v56, 0.0  ;;  %v556_v62 = vmax.f32 %v552_v58, 0.0 }
 0x2b0   :  { %v558_v0 = vrot.slane %v554_v59, 7  ;;  %694 = vmatprep.mubr.f32.mxu1 %v554_v59  ;;  %v561_v1 = vrot.slane %v557_v60, 7  ;;  %v570_v3 = vrot.slane %v554_v59, 1  ;;  %v571_v57 = vrot.slane %v555_v61, 1 }
 0x2b1   :  { %v572_v4 = vrot.slane %v556_v62, 1  ;;  %v573_v2 = vrot.slane %v557_v60, 1  ;;  %v559_v6 = vrot.slane %v555_v61, 7  ;;  %v560_v10 = vrot.slane %v556_v62, 7 }
 0x2b2   :  { %v565_v53 = vsel %vm113_vm0, %v561_v1, %v558_v0  ;;  %v576_v50 = vsel %vm126_vm1, %v570_v3, %v571_v57 }
 0x2b3   :  { %1128 = vmatmul.mubr.msk.f32.vlgmr.msra.gmra.mxu1 %vm1735_vm2, %v565_v53  ;;  %1429 = vmatprep.mubr.f32.mxu0 %v576_v50  ;;  %v575_v7 = vsel %vm126_vm1, %v571_v57, %v572_v4  ;;  %v574_v8 = vsel %vm126_vm1, %v572_v4, %v573_v2  ;;  %v564_v9 = vsel %vm113_vm0, %v558_v0, %v559_v6  ;;  %v1016_v57 = vld [vmem:[%s2251_s3 + $0x70] sm:$0xff]  ;;  %v1014_v53 = vld [vmem:[%s2251_s3 + $0x60] sm:$0xff]  ;;  %v1013_v50 = vld [vmem:[%s2251_s3 + $0x58] sm:$0xff] }
 0x2b4   :  { %699 = vmatprep.mubr.f32.mxu1 %v555_v61  ;;  %1430 = vmatmul.mubr.msk.f32.vlgmr.msra.gmra.mxu0 %vm1749_vm3, %v575_v7  ;;  %v577_v63 = vsel %vm126_vm1, %v573_v2, %v570_v3  ;;  %v563_v5 = vsel %vm113_vm0, %v559_v6, %v560_v10  ;;  %v562_v12 = vsel %vm113_vm0, %v560_v10, %v561_v1  ;;  %v1017_v1 = vld [vmem:[%s2251_s3 + $0x78] sm:$0xff]  ;;  %v1015_v2 = vld [vmem:[%s2251_s3 + $0x68] sm:$0xff]  ;;  %v1012_v6 = vld [vmem:[%s2251_s3 + $0x50] sm:$0xff] }
 0x2b5   :  { %1432 = vmatprep.mubr.f32.mxu0 %v574_v8  ;;  %1436 = vmatpush3.msra.mxu1 %v1789_v18  ;;  %v1010_v7 = vld [vmem:[%s2251_s3 + $0x40] sm:$0xff]  ;;  %v1009_v8 = vld [vmem:[%s2251_s3 + $0x38] sm:$0xff]  ;;  %v1007_v10 = vld [vmem:[%s2251_s3 + $0x28] sm:$0xff] }
 0x2b6   :  { %1437 = vmatprep.subr.mxu1 %v1519_v17  ;;  %1471 = vmatpush3.msra.mxu0 %v1905_v34 }
 0x2b7   :  { %700 = vmatmul.mubr.f32.gmra.mxu1 %v564_v9  ;;  %1475 = vmatprep.subr.mxu0 %v1017_v1  ;;  %v1008_v9 = vld [vmem:[%s2251_s3 + $0x30] sm:$0xff] }
 0x2b8   :  { %704 = vmatprep.mubr.f32.mxu1 %v556_v62  ;;  %1433 = vmatmul.mubr.msk.f32.gmra.mxu0 %vm1765_vm4, %v577_v63  ;;  %v1006_v63 = vld [vmem:[%s2251_s3 + $0x20] sm:$0xff] }
 0x2b9   :  { %1438 = vmatpush3.msra.mxu1 %v1797_v19  ;;  %1472 = vmatprep.mubr.msk.f32.mxu0 %vm1520_vm6, %v1519_v17 }
 0x2ba   :  { %1439 = vmatprep.subr.mxu1 %v1519_v17 }
 0x2bb   :  { %1129 = vmatmul.mubr.msk.f32.gmra.mxu1 %vm1772_vm5, %v563_v5  ;;  %v1005_v5 = vld [vmem:[%s2251_s3 + $0x18] sm:$0xff] }
 0x2bc   :  { %709 = vmatprep.mubr.f32.mxu1 %v557_v60  ;;  %1440 = vmatpush3.msra.mxu1 %v1804_v20 }
 0x2bd   :  { %1441 = vmatprep.subr.mxu1 %v1519_v17 }
 0x2be   :  { %1442 = vmatpush3.msra.mxu1 %v1811_v21 }
 0x2bf   :  { %710 = vmatmul.mubr.f32.gmra.mxu1 %v562_v12  ;;  %1443 = vmatprep.subr.mxu1 %v1519_v17  ;;  %v1004_v12 = vld [vmem:[%s2251_s3 + $0x10] sm:$0xff] }
 0x2c0   :  { %1444 = vmatpush3.msra.mxu1 %v1818_v22  ;;  %1467 = vmatprep.mubr.msk.f32.mxu1 %vm1520_vm6, %v1519_v17 }
 0x2c1   :  { %1445 = vmatprep.subr.mxu1 %v1519_v17 }
 0x2c2   :  { %1446 = vmatpush3.msra.mxu1 %v1825_v23 }
 0x2c3   :  { %1447 = vmatprep.subr.mxu1 %v1519_v17 }
 0x2c4   :  { %1448 = vmatpush3.msra.mxu1 %v1832_v24 }
 0x2c5   :  { %1449 = vmatprep.subr.mxu1 %v1519_v17 }
 0x2c6   :  { %1450 = vmatpush3.msra.mxu1 %v1839_v25 }
 0x2c7   :  { %1451 = vmatprep.subr.mxu1 %v1519_v17 }
 0x2c8   :  { %1452 = vmatpush3.msra.mxu1 %v1846_v26 }
 0x2c9   :  { %1453 = vmatprep.subr.mxu1 %v1519_v17 }
 0x2ca   :  { %1454 = vmatpush3.msra.mxu1 %v1853_v27 }
 0x2cb   :  { %1455 = vmatprep.subr.mxu1 %v1519_v17 }
 0x2cc   :  { %1456 = vmatpush3.msra.mxu1 %v1860_v28 }
 0x2cd   :  { %1457 = vmatprep.subr.mxu1 %v1519_v17 }
 0x2ce   :  { %1458 = vmatpush3.msra.mxu1 %v1867_v29 }
 0x2cf   :  { %1459 = vmatprep.subr.mxu1 %v1519_v17 }
 0x2d0   :  { %1460 = vmatpush3.msra.mxu1 %v1873_v30 }
 0x2d1   :  { %1461 = vmatprep.subr.mxu1 %v1519_v17 }
 0x2d2   :  { %1462 = vmatpush3.msra.mxu1 %v1879_v31 }
 0x2d3   :  { %1463 = vmatprep.subr.mxu1 %v1519_v17 }
 0x2d4   :  { %1464 = vmatpush3.msra.mxu1 %v1890_v32 }
 0x2d5   :  { %1465 = vmatprep.subr.mxu1 %v1519_v17 }
 0x2d6   :  { %1466 = vmatpush3.msra.mxu1 %v1897_v33 }
 0x373   :  { %v1248_v14 = vpop.f32.mrf.mxu1 }
 0x374   :  { %v1431_v18 = vpop.f32.mrf.mxu0 }
 0x375   :  { %v1249_v19 = vpop.f32.mrf.mxu1 }
 0x376   :  { %v781_v20 = vpop.f32.mrf.mxu0  ;;  %v1250_v23 = vadd.f32 %v1249_v19, %v1248_v14  ;;  %v1003_v14 = vld [vmem:[%s2251_s3 + $0x8] sm:$0xff] }
 0x377   :  { %v1251_v21 = vpop.f32.mrf.mxu1 }
 0x378   :  { %v1434_v25 = vpop.f32.mrf.mxu0  ;;  %v2151_v29 = vadd.f32 %v1250_v23, %v781_v20 }
 0x379   :  { %v1252_v22 = vpop.f32.mrf.mxu1 }
 0x37a   :  { %v1253_v24 = vadd.f32 %v1252_v22, %v1251_v21  ;;  %v791_v31 = vpop.f32.mrf.mxu0  ;;  %v809_v11 = vmul.f32 %v2151_v29, %v2151_v29 }
 0x37b   :  { %v1254_v26 = vpop.f32.mrf.mxu1 }
 0x37c   :  { %v2149_v27 = vadd.f32 %v1431_v18, %v1253_v24  ;;  %v1002_v18 = vld [vmem:[%s2251_s3] sm:$0xff] }
 0x37d   :  { %v1255_v28 = vpop.f32.mrf.mxu1 }
 0x37e   :  { %v1256_v30 = vadd.f32 %v1255_v28, %v1254_v26  ;;  %v810_v32 = vmul.f32 %v2149_v27, %v2149_v27  ;;  %v800_v13 = vadd.f32 %v2149_v27, %v2151_v29 }
 0x37f   :  { %v1257_v17 = vpop.f32.mrf.mxu1 }
 0x380   :  { %v2155_v33 = vadd.f32 %v1256_v30, %v791_v31  ;;  %v813_v37 = vadd.f32 %v810_v32, %v809_v11  ;;  %v988_v31 = vsub.s32 2, %v1663_v35  ;;  %v996_v11 = vsub.s32 3, %v1663_v35 }
 0x381   :  { %v1258_v34 = vpop.f32.mrf.mxu1 }
 0x382   :  { %v811_v16 = vmul.f32 %v2155_v33, %v2155_v33  ;;  %v1259_v36 = vadd.f32 %v1258_v34, %v1257_v17  ;;  %v801_v38 = vadd.f32 %v800_v13, %v2155_v33 }
 0x384   :  { %v2164_v39 = vadd.f32 %v1434_v25, %v1259_v36  ;;  %v814_v40 = vadd.f32 %v813_v37, %v811_v16 }
 0x386   :  { %v802_v43 = vadd.f32 %v801_v38, %v2164_v39  ;;  %v812_v45 = vmul.f32 %v2164_v39, %v2164_v39 }
 0x388   :  { %v803_v46 = vrot.slane %v802_v43, 4  ;;  %v815_v47 = vadd.f32 %v814_v40, %v812_v45 }
 0x38a   :  { %v804_v49 = vadd.f32 %v803_v46, %v802_v43  ;;  %v816_v51 = vrot.slane %v815_v47, 4 }
 0x38c   :  { %v805_v52 = vrot.slane %v804_v49, 2  ;;  %v817_v54 = vadd.f32 %v816_v51, %v815_v47 }
 0x38e   :  { %v806_v55 = vadd.f32 %v805_v52, %v804_v49  ;;  %v818_v56 = vrot.slane %v817_v54, 2 }
 0x390   :  { %v807_v58 = vrot.slane %v806_v55, 1  ;;  %v819_v59 = vadd.f32 %v818_v56, %v817_v54 }
 0x392   :  { %v820_v60 = vrot.slane %v819_v59, 1  ;;  %v808_v61 = vadd.f32 %v807_v58, %v806_v55 }
 0x394   :  { %v821_v62 = vadd.f32 %v820_v60, %v819_v59 }
 0x396   :  { %v822_v0 = vsel %vm375_vm7, %v808_v61, %v821_v62 }
 0x397   :  { %1468 = vmatmul.mubr.f32.vlgmr.msra.gmra.mxu1 %v822_v0 }
 0x457   :  { %v889_v3 = vpop.f32.mrf.mxu1 }
 0x458   :  { %1473 = vmatmul.mubr.msk.f32.vlgmr.msra.gmra.mxu0 %vm447_vm8, %v889_v3 }
 0x459   :  { %1476 = vmatpush3.msra.mxu0 %v1017_v1  ;;  %v1469_v4 = vpop.f32.mrf.mxu1  ;;  %1507 = vmatprep.mubr.f32.mxu0 %v1683_v41  ;;  %v1011_v41 = vld [vmem:[%s2251_s3 + $0x48] sm:$0xff] }
 0x45a   :  { %1477 = vmatprep.subr.mxu0 %v1016_v57 }
 0x45b   :  { %1478 = vmatpush3.msra.mxu0 %v1016_v57 }
 0x45c   :  { %1479 = vmatprep.subr.mxu0 %v1015_v2 }
 0x45d   :  { %1480 = vmatpush3.msra.mxu0 %v1015_v2 }
 0x45e   :  { %1481 = vmatprep.subr.mxu0 %v1014_v53 }
 0x45f   :  { %1482 = vmatpush3.msra.mxu0 %v1014_v53 }
 0x460   :  { %1483 = vmatprep.subr.mxu0 %v1013_v50 }
 0x461   :  { %1484 = vmatpush3.msra.mxu0 %v1013_v50 }
 0x462   :  { %1485 = vmatprep.subr.mxu0 %v1012_v6 }
 0x463   :  { %1486 = vmatpush3.msra.mxu0 %v1012_v6 }
 0x464   :  { %1487 = vmatprep.subr.mxu0 %v1011_v41 }
 0x465   :  { %1488 = vmatpush3.msra.mxu0 %v1011_v41 }
 0x466   :  { %1489 = vmatprep.subr.mxu0 %v1010_v7 }
 0x467   :  { %1490 = vmatpush3.msra.mxu0 %v1010_v7 }
 0x468   :  { %1491 = vmatprep.subr.mxu0 %v1009_v8 }
 0x469   :  { %1492 = vmatpush3.msra.mxu0 %v1009_v8 }
 0x46a   :  { %1493 = vmatprep.subr.mxu0 %v1008_v9 }
 0x46b   :  { %1494 = vmatpush3.msra.mxu0 %v1008_v9 }
 0x46c   :  { %1495 = vmatprep.subr.mxu0 %v1007_v10 }
 0x46d   :  { %1496 = vmatpush3.msra.mxu0 %v1007_v10 }
 0x46e   :  { %1497 = vmatprep.subr.mxu0 %v1006_v63 }
 0x46f   :  { %1498 = vmatpush3.msra.mxu0 %v1006_v63 }
 0x470   :  { %1499 = vmatprep.subr.mxu0 %v1005_v5 }
 0x471   :  { %1500 = vmatpush3.msra.mxu0 %v1005_v5 }
 0x472   :  { %1501 = vmatprep.subr.mxu0 %v1004_v12 }
 0x473   :  { %1502 = vmatpush3.msra.mxu0 %v1004_v12 }
 0x474   :  { %1503 = vmatprep.subr.mxu0 %v1003_v14 }
 0x475   :  { %1504 = vmatpush3.msra.mxu0 %v1003_v14 }
 0x476   :  { %1505 = vmatprep.subr.mxu0 %v1002_v18 }
 0x477   :  { %1506 = vmatpush3.msra.mxu0 %v1002_v18 }
 0x478   :  { %1508 = vmatmul.mubr.f32.vlgmr.msra.gmra.mxu0 %v1696_v44  ;;  %v1020_v44 = vsub.s32 4, %v1663_v35 }
 0x479   :  { %1510 = vmatprep.mubr.f32.mxu0 %v1708_v48 }
 0x47a   :  { %v1021_v13 = vrot.slane %v2079_v15, %v1020_v44 }
 0x47c   :  { %1511 = vmatmul.mubr.f32.gmra.mxu0 %v1688_v42 }
 0x518   :  { %v962_v19 = vpop.f32.mrf.mxu0 }
 0x519   :  { %v966_v20 = vmul.f32 0.001953125, %v962_v19 }
 0x51a   :  { %v1474_v21 = vpop.f32.mrf.mxu0 }
 0x51b   :  { %v967_v22 = vmul.f32 %v966_v20, %v966_v20 }
 0x51d   :  { %v969_v23 = vrot.slane %v967_v22, 7 }
 0x51f   :  { %v971_v24 = vsub.f32 %v966_v20, %v969_v23 }
 0x521   :  { %v972_v25 = vadd.f32 1e-05, %v971_v24 }
 0x523   :  { %1517 = vrsqrt.f32 %v972_v25 }
 0x530   :  { %v1518_v26 = vpop.eup %1517 }
 0x531   :  { %v975_v28 = vrot.slane %v1518_v26, 7 }
 0x533   :  { %v977_v30 = vmul.f32 %v975_v28, %v2079_v15 }
 0x535   :  { %v979_v17 = vrot.slane %v977_v30, 2  ;;  %v989_v32 = vrot.slane %v977_v30, %v988_v31 }
 0x537   :  { %v981_v48 = vmul.f32 %v979_v17, %v966_v20  ;;  %v991_v37 = vmul.f32 %v989_v32, %v2149_v27  ;;  %v990_v43 = vmul.f32 %v989_v32, %v2151_v29  ;;  %v993_v45 = vmul.f32 %v989_v32, %v2164_v39 }
 0x538   :  { %v1509_v42 = vpop.f32.mrf.mxu0  ;;  %v992_v46 = vmul.f32 %v989_v32, %v2155_v33 }
 0x539   :  { %v983_v34 = vrot.slane %v981_v48, 5  ;;  %v1094_v47 = vadd.f32 %v1509_v42, %v1021_v13 }
 0x53a   :  { %v1088_v16 = vpop.f32.mrf.mxu0 }
 0x53b   :  { %v985_v36 = vsub.f32 %v2079_v15, %v983_v34  ;;  %v1089_v49 = vadd.f32 %v1088_v16, %v1021_v13 }
 0x53c   :  { %v1512_v38 = vpop.f32.mrf.mxu0 }
 0x53d   :  { %v997_v40 = vrot.slane %v985_v36, %v996_v11  ;;  %v1104_v51 = vadd.f32 %v1512_v38, %v1021_v13 }
 0x53e   :  { %v1098_v52 = vpop.f32.mrf.mxu0 }
 0x53f   :  { %v999_v35 = vadd.f32 %v997_v40, %v991_v37  ;;  %v998_v54 = vadd.f32 %v997_v40, %v990_v43  ;;  %v1001_v55 = vadd.f32 %v997_v40, %v993_v45  ;;  %v1000_v56 = vadd.f32 %v997_v40, %v992_v46 }
 0x540   :  { %v1099_v58 = vadd.f32 %v1098_v52, %v1021_v13 }
 0x541   :  { %v1108_v15 = vadd.f32 %v1094_v47, %v999_v35  ;;  %v1107_v59 = vadd.f32 %v1089_v49, %v998_v54  ;;  %v1110_v27 = vadd.f32 %v1104_v51, %v1001_v55 }
 0x542   :  { %v1109_v60 = vadd.f32 %v1099_v58, %v1000_v56 }
 0x543   :  { %v1112_v61 = vmax.f32 %v1108_v15, 0.0  ;;  %v1111_v62 = vmax.f32 %v1107_v59, 0.0  ;;  %v1114_v29 = vmax.f32 %v1110_v27, 0.0 }
 0x544   :  { %v1113_v0 = vmax.f32 %v1109_v60, 0.0 }
 0x545   :  { %1116 = vst [vmem:[%s2252_s7 + $0x8] sm:$0xff] %v1112_v61  ;;  %1115 = vst [vmem:[%s2252_s7] sm:$0xff] %v1111_v62 }
 0x546   :  { %1118 = vst [vmem:[%s2252_s7 + $0x18] sm:$0xff] %v1114_v29  ;;  %1117 = vst [vmem:[%s2252_s7 + $0x10] sm:$0xff] %v1113_v0 }

</bundles_post_ra>
